<compile_context>
chip_gen: v7x
topology: tpu7x:2x2x1
jax: 0.10.0
libtpu: 0.0.40
codegen_flags: <defaults>
</compile_context>

<pallas_src>
import functools

import jax
import jax.numpy as jnp
from jax import lax
from jax.experimental import pallas as pl
from jax.experimental.pallas import tpu as pltpu


def _round_up(x, m):
    return (x + m - 1) // m * m


def _cdiv(a, b):
    return -(-a // b)


def _policy_kernel(state_ref, params_ref, out_ref, xpad_ref, *,
                   state_dim, s_lanes, c_lanes, o_lanes, action_dim,
                   n_hidden, w_off, w_rows, bias_base,
                   min_log_std, max_log_std, compute_dtype):
    # Zero-pad the narrow state tile to lane-aligned width inside VMEM (keeps
    # the HBM-side state DMA at its natural (batch, state_dim) size).
    if state_dim == s_lanes:
        xpad_ref[...] = state_ref[...]
    else:
        xpad_ref[...] = jnp.zeros_like(xpad_ref)
        xpad_ref[:, :state_dim] = state_ref[...]
    h = xpad_ref[...]                                   # (bm, s_lanes) bf16

    # Hidden stack: Linear + ReLU.  bf16 operands, f32 MXU accumulation.
    # Weight block i occupies rows [w_off[i], w_off[i]+w_rows[i]); bias i is a
    # single row at bias_base + 8*i (multiple-of-8 offsets stay tile-aligned
    # for packed bf16 sublanes).  All slices are static.
    for i in range(n_hidden):
        w = params_ref[w_off[i]:w_off[i] + w_rows[i], :c_lanes]
        b = params_ref[bias_base + 8 * i:bias_base + 8 * i + 1, :c_lanes]
        y = jnp.dot(h, w, preferred_element_type=jnp.float32)
        h = jnp.maximum(y + b.astype(jnp.float32), 0.0).astype(compute_dtype)

    # Fused mean / log_std head: one matmul over a 128-lane slab,
    # cols [0, A) = mean, [A, 2A) = log_std.
    hw = params_ref[w_off[n_hidden]:w_off[n_hidden] + w_rows[n_hidden], :o_lanes]
    hb = params_ref[bias_base + 8 * n_hidden:bias_base + 8 * n_hidden + 1, :o_lanes]
    y = jnp.dot(h, hw, preferred_element_type=jnp.float32) + hb.astype(jnp.float32)

    # clamp+exp only matters on the log_std lanes; mean lanes pass through raw.
    col = lax.broadcasted_iota(jnp.int32, y.shape, 1)
    is_std = (col >= action_dim) & (col < 2 * action_dim)
    std = jnp.exp(jnp.clip(y, min_log_std, max_log_std))
    out_ref[...] = jnp.where(is_std, std, y).astype(out_ref.dtype)


def build_gaussian_policy_forward(state_dim, hidden_units, action_dim,
                                  min_log_std=-20.0, max_log_std=2.0,
                                  max_block_batch=512,
                                  min_parallel_tiles=2,
                                  parallel_batch_threshold=16,
                                  compute_dtype=jnp.bfloat16):
    """Returns (forward, pack_params).

    pack_params(params) -> one packed (bf16) parameter buffer.  Call ONCE and
    keep the result resident on device; do not re-pack per step.
    forward(state, packed_params) -> (mean, std); state is [batch, state_dim].
    """
    n_hidden = len(hidden_units)
    assert n_hidden >= 1, "GaussianPolicy requires at least one hidden layer"
    n_layers = n_hidden + 1
    s_lanes = _round_up(max(state_dim, 1), 128)          # state lane width
    c_lanes = _round_up(max(max(hidden_units), 1), 128)  # hidden lane width
    o_lanes = _round_up(max(2 * action_dim, 1), 128)     # head / output width
    pw = max(c_lanes, o_lanes)                           # packed-buffer lanes

    # Row layout of the packed buffer: weight blocks (all offsets are
    # multiples of 128), then an 8-row-strided bias section.
    w_rows = (s_lanes,) + (c_lanes,) * (n_hidden - 1) + (c_lanes,)
    w_off, off = [], 0
    for r in w_rows:
        w_off.append(off)
        off += r
    w_off = tuple(w_off)
    bias_base = off
    p_rows = bias_base + 8 * n_layers

    def pack_params(params):
        """params = [w1,b1,...,wn,bn, wm,bm, ws,bs]; weights [in,out], biases [out]/[1,out]."""
        buf = jnp.zeros((p_rows, pw), compute_dtype)
        for i in range(n_hidden):
            w, b = params[2 * i], params[2 * i + 1]
            r0 = w_off[i]
            buf = buf.at[r0:r0 + w.shape[0], :w.shape[1]].set(w.astype(compute_dtype))
            buf = buf.at[bias_base + 8 * i, :w.shape[1]].set(
                jnp.ravel(b).astype(compute_dtype))
        wm, bm_, ws, bs = params[2 * n_hidden:2 * n_hidden + 4]
        hdim, adim = hidden_units[-1], action_dim
        r0 = w_off[n_hidden]
        buf = buf.at[r0:r0 + hdim, :adim].set(wm.astype(compute_dtype))
        buf = buf.at[r0:r0 + hdim, adim:2 * adim].set(ws.astype(compute_dtype))
        buf = buf.at[bias_base + 8 * n_hidden, :adim].set(
            jnp.ravel(bm_).astype(compute_dtype))
        buf = buf.at[bias_base + 8 * n_hidden, adim:2 * adim].set(
            jnp.ravel(bs).astype(compute_dtype))
        return buf

    kernel = functools.partial(
        _policy_kernel, state_dim=state_dim, s_lanes=s_lanes, c_lanes=c_lanes,
        o_lanes=o_lanes, action_dim=action_dim, n_hidden=n_hidden,
        w_off=w_off, w_rows=w_rows, bias_base=bias_base,
        min_log_std=float(min_log_std), max_log_std=float(max_log_std),
        compute_dtype=compute_dtype)

    def forward(state, packed_params):
        batch = state.shape[0]
        b8 = _round_up(batch, 8)
        # Pick the batch tile: as big as allowed, but with >= min_parallel_tiles
        # grid steps for medium/large batches so v7x's 2 TensorCores both work,
        # and sized to minimize last-tile padding waste.
        if batch >= parallel_batch_threshold:
            n_tiles = max(min_parallel_tiles, _cdiv(b8, max_block_batch))
        else:
            n_tiles = 1
        bm = min(_round_up(_cdiv(b8, n_tiles), 8), _round_up(max_block_batch, 8))
        n_tiles = _cdiv(b8, bm)

        x = state.astype(compute_dtype)          # narrow (batch, state_dim) DMA

        out = pl.pallas_call(
            kernel,
            out_shape=jax.ShapeDtypeStruct((batch, o_lanes), jnp.float32),
            grid=(n_tiles,),
            in_specs=[
                # batch-tiled narrow state (block last dim == full array dim)
                pl.BlockSpec((bm, state_dim), lambda i: (i, 0)),
                # packed params: constant block index -> resident across tiles
                pl.BlockSpec((p_rows, pw), lambda i: (0, 0)),
            ],
            out_specs=pl.BlockSpec((bm, o_lanes), lambda i: (i, 0)),
            scratch_shapes=[pltpu.VMEM((bm, s_lanes), compute_dtype)],
            compiler_params=pltpu.CompilerParams(
                dimension_semantics=("parallel",)),
        )(x, packed_params)

        mean = out[:, :action_dim]
        std = out[:, action_dim:2 * action_dim]
        return mean, std

    return forward, pack_params


def init_linear_params(key, in_dim, out_dim, dtype=jnp.float32):
    """PyTorch-style init U(-1/sqrt(fan_in), 1/sqrt(fan_in)); weight as [in, out]."""
    kw, kb = jax.random.split(key)
    bound = 1.0 / jnp.sqrt(jnp.float32(in_dim))
    w = jax.random.uniform(kw, (in_dim, out_dim), dtype, -bound, bound)
    b = jax.random.uniform(kb, (1, out_dim), dtype, -bound, bound)
    return w, b


def gaussian_policy_reference(state, params, hidden_units,
                              min_log_std=-20.0, max_log_std=2.0,
                              compute_dtype=jnp.float32):
    """Plain-JAX reference of GaussianPolicy.forward.

    compute_dtype=float32   -> exact PyTorch-equivalent math.
    compute_dtype=bfloat16  -> emulates the kernel's bf16-operand / f32-accum path.
    """
    cdt = compute_dtype
    h = state.astype(cdt)
    idx = 0
    for _ in hidden_units:
        w, b = params[idx].astype(cdt), params[idx + 1].astype(cdt)
        idx += 2
        y = jnp.dot(h, w, preferred_element_type=jnp.float32) + b.astype(jnp.float32)
        h = jnp.maximum(y, 0.0).astype(cdt)
    wm, bm_, ws, bs = [p.astype(cdt) for p in params[idx:idx + 4]]
    mean = jnp.dot(h, wm, preferred_element_type=jnp.float32) + bm_.astype(jnp.float32)
    log_std = jnp.dot(h, ws, preferred_element_type=jnp.float32) + bs.astype(jnp.float32)
    log_std = jnp.clip(log_std, min_log_std, max_log_std)
    return mean, jnp.exp(log_std)


if __name__ == "__main__":
    # Small shapes consistent with the module: state_dim=8, hidden=[32, 32],
    # action_dim=4, batch=2.
    batch, state_dim, action_dim = 2, 8, 4
    hidden_units = [32, 32]
    min_log_std, max_log_std = -20.0, 2.0

    key = jax.random.PRNGKey(0)
    key, ks = jax.random.split(key)
    state = jax.random.normal(ks, (batch, state_dim), jnp.float32)

    # Deterministic parameter init (hidden layers, mean head, log_std head).
    params = []
    prev = state_dim
    for units in hidden_units:
        key, kl = jax.random.split(key)
        w, b = init_linear_params(kl, prev, units)
        params += [w, b]
        prev = units
    key, km = jax.random.split(key)
    w_mean, b_mean = init_linear_params(km, prev, action_dim)
    key, kv = jax.random.split(key)
    w_std, b_std = init_linear_params(kv, prev, action_dim)
    params += [w_mean, b_mean, w_std, b_std]

    forward, pack_params = build_gaussian_policy_forward(
        state_dim, hidden_units, action_dim,
        min_log_std=min_log_std, max_log_std=max_log_std)

    packed = pack_params(params)        # one-time packing; keep device-resident
    forward = jax.jit(forward)
    mean, std = forward(state, packed)
    jax.block_until_ready((mean, std))

    # Tight check vs. a reference that emulates the kernel's bf16/f32-acc math.
    mean_q, std_q = gaussian_policy_reference(
        state, params, hidden_units, min_log_std, max_log_std,
        compute_dtype=jnp.bfloat16)
    # Loose check vs. the exact float32 PyTorch-equivalent reference
    # (tolerance reflects bf16 weight/activation quantization).
    mean_f, std_f = gaussian_policy_reference(
        state, params, hidden_units, min_log_std, max_log_std,
        compute_dtype=jnp.float32)

    assert mean.shape == (batch, action_dim) and std.shape == (batch, action_dim)
    assert jnp.allclose(mean, mean_q, atol=1e-3, rtol=1e-3)
    assert jnp.allclose(std, std_q, atol=1e-3, rtol=1e-3)
    assert jnp.allclose(mean, mean_f, atol=1e-1, rtol=1e-1)
    assert jnp.allclose(std, std_f, atol=1e-1, rtol=1e-1)

    # TODO(synk): sample()/get_action() (Normal.rsample + tanh squashing +
    # log_prob) are stochastic inference helpers outside forward(); not kernelized.
    print("KERNEL_OK")
</pallas_src>

<mosaic_0001>
module attributes {stable_mosaic.version = 11 : i64} {
  func.func @_policy_kernel(%arg0: i32, %arg1: memref<8x8xbf16, #tpu.memory_space<vmem>>, %arg2: memref<408x128xbf16, #tpu.memory_space<vmem>>, %arg3: memref<8x128xf32, #tpu.memory_space<vmem>>, %arg4: memref<8x128xbf16, #tpu.memory_space<vmem>>) attributes {dimension_semantics = [#tpu.dimension_semantics<parallel>], iteration_bounds = array<i64: 1>, scalar_prefetch = 0 : i64, scratch_operands = 1 : i64, tpu.core_type = #tpu.core_type<tc>, window_params = [{transform_indices = @transform_0, window_bounds = array<i64: 8, 8>}, {pipeline_mode = #tpu.pipeline_mode<synchronous>, transform_indices = @transform_1, window_bounds = array<i64: 408, 128>}, {transform_indices = @transform_2, window_bounds = array<i64: 8, 128>}]} {
    %cst = arith.constant 0.000000e+00 : bf16
    %0 = vector.broadcast %cst : bf16 to vector<8x128xbf16>
    %c0 = arith.constant 0 : index
    %c0_0 = arith.constant 0 : index
    %1 = vector.load %arg4[%c0, %c0_0] : memref<8x128xbf16, #tpu.memory_space<vmem>>, vector<8x128xbf16>
    tpu.vector_store %arg4[%c0, %c0_0], %0 {strides = array<i32>} : memref<8x128xbf16, #tpu.memory_space<vmem>>, vector<8x128xbf16>,
    %c0_1 = arith.constant 0 : index
    %c0_2 = arith.constant 0 : index
    %2 = vector.load %arg1[%c0_1, %c0_2] : memref<8x8xbf16, #tpu.memory_space<vmem>>, vector<8x8xbf16>
    %c0_3 = arith.constant 0 : index
    %c0_4 = arith.constant 0 : index
    %3 = vector.load %arg4[%c0_3, %c0_4] : memref<8x128xbf16, #tpu.memory_space<vmem>>, vector<8x8xbf16>
    tpu.vector_store %arg4[%c0_3, %c0_4], %2 {strides = array<i32>} : memref<8x128xbf16, #tpu.memory_space<vmem>>, vector<8x8xbf16>,
    %c0_5 = arith.constant 0 : index
    %c0_6 = arith.constant 0 : index
    %4 = vector.load %arg4[%c0_5, %c0_6] : memref<8x128xbf16, #tpu.memory_space<vmem>>, vector<8x128xbf16>
    %c0_7 = arith.constant 0 : index
    %c0_8 = arith.constant 0 : index
    %5 = vector.load %arg2[%c0_7, %c0_8] : memref<408x128xbf16, #tpu.memory_space<vmem>>, vector<128x128xbf16>
    %c384 = arith.constant 384 : index
    %c0_9 = arith.constant 0 : index
    %6 = vector.load %arg2[%c384, %c0_9] : memref<408x128xbf16, #tpu.memory_space<vmem>>, vector<1x128xbf16>
    %cst_10 = arith.constant dense<0.000000e+00> : vector<8x128xf32>
    %7 = tpu.matmul %4, %5, %cst_10 {dimension_numbers = #tpu.dot_dimension_numbers<[1], [0], [0], [1], [0, 0, 1, 1], [], []>} : vector<8x128xbf16>, vector<128x128xbf16>, vector<8x128xf32> -> vector<8x128xf32>
    %8 = arith.extf %6 : vector<1x128xbf16> to vector<1x128xf32>
    %9 = vector.broadcast %8 : vector<1x128xf32> to vector<8x128xf32>
    %10 = arith.addf %7, %9 : vector<8x128xf32>
    %cst_11 = arith.constant 0.000000e+00 : f32
    %11 = vector.broadcast %cst_11 : f32 to vector<8x128xf32>
    %12 = arith.maximumf %10, %11 : vector<8x128xf32>
    %13 = arith.truncf %12 : vector<8x128xf32> to vector<8x128xbf16>
    %c128 = arith.constant 128 : index
    %c0_12 = arith.constant 0 : index
    %14 = vector.load %arg2[%c128, %c0_12] : memref<408x128xbf16, #tpu.memory_space<vmem>>, vector<128x128xbf16>
    %c392 = arith.constant 392 : index
    %c0_13 = arith.constant 0 : index
    %15 = vector.load %arg2[%c392, %c0_13] : memref<408x128xbf16, #tpu.memory_space<vmem>>, vector<1x128xbf16>
    %cst_14 = arith.constant dense<0.000000e+00> : vector<8x128xf32>
    %16 = tpu.matmul %13, %14, %cst_14 {dimension_numbers = #tpu.dot_dimension_numbers<[1], [0], [0], [1], [0, 0, 1, 1], [], []>} : vector<8x128xbf16>, vector<128x128xbf16>, vector<8x128xf32> -> vector<8x128xf32>
    %17 = arith.extf %15 : vector<1x128xbf16> to vector<1x128xf32>
    %18 = vector.broadcast %17 : vector<1x128xf32> to vector<8x128xf32>
    %19 = arith.addf %16, %18 : vector<8x128xf32>
    %cst_15 = arith.constant 0.000000e+00 : f32
    %20 = vector.broadcast %cst_15 : f32 to vector<8x128xf32>
    %21 = arith.maximumf %19, %20 : vector<8x128xf32>
    %22 = arith.truncf %21 : vector<8x128xf32> to vector<8x128xbf16>
    %c256 = arith.constant 256 : index
    %c0_16 = arith.constant 0 : index
    %23 = vector.load %arg2[%c256, %c0_16] : memref<408x128xbf16, #tpu.memory_space<vmem>>, vector<128x128xbf16>
    %c400 = arith.constant 400 : index
    %c0_17 = arith.constant 0 : index
    %24 = vector.load %arg2[%c400, %c0_17] : memref<408x128xbf16, #tpu.memory_space<vmem>>, vector<1x128xbf16>
    %cst_18 = arith.constant dense<0.000000e+00> : vector<8x128xf32>
    %25 = tpu.matmul %22, %23, %cst_18 {dimension_numbers = #tpu.dot_dimension_numbers<[1], [0], [0], [1], [0, 0, 1, 1], [], []>} : vector<8x128xbf16>, vector<128x128xbf16>, vector<8x128xf32> -> vector<8x128xf32>
    %26 = arith.extf %24 : vector<1x128xbf16> to vector<1x128xf32>
    %27 = vector.broadcast %26 : vector<1x128xf32> to vector<8x128xf32>
    %28 = arith.addf %25, %27 : vector<8x128xf32>
    %29 = tpu.iota {dimensions = array<i32: 1>} : vector<8x128xi32>
    %c4_i32 = arith.constant 4 : i32
    %30 = vector.broadcast %c4_i32 : i32 to vector<8x128xi32>
    %31 = arith.cmpi sge, %29, %30 : vector<8x128xi32>
    %c8_i32 = arith.constant 8 : i32
    %32 = vector.broadcast %c8_i32 : i32 to vector<8x128xi32>
    %33 = arith.cmpi slt, %29, %32 : vector<8x128xi32>
    %34 = arith.andi %31, %33 : vector<8x128xi1>
    %cst_19 = arith.constant -2.000000e+01 : f32
    %cst_20 = arith.constant 2.000000e+00 : f32
    %35 = vector.broadcast %cst_19 : f32 to vector<8x128xf32>
    %36 = arith.maximumf %35, %28 : vector<8x128xf32>
    %37 = vector.broadcast %cst_20 : f32 to vector<8x128xf32>
    %38 = arith.minimumf %37, %36 : vector<8x128xf32>
    %39 = math.exp %38 : vector<8x128xf32>
    %40 = arith.select %34, %39, %28 : vector<8x128xi1>, vector<8x128xf32>
    %c0_21 = arith.constant 0 : index
    %c0_22 = arith.constant 0 : index
    %41 = vector.load %arg3[%c0_21, %c0_22] : memref<8x128xf32, #tpu.memory_space<vmem>>, vector<8x128xf32>
    tpu.vector_store %arg3[%c0_21, %c0_22], %40 {strides = array<i32>} : memref<8x128xf32, #tpu.memory_space<vmem>>, vector<8x128xf32>,
    return
  }
  func.func @transform_0(%arg0: i32) -> (i32, i32) {
    %c0_i32 = arith.constant 0 : i32
    %c0_i32_0 = arith.constant 0 : i32
    return %arg0, %c0_i32 : i32, i32
  }
  func.func @transform_1(%arg0: i32) -> (i32, i32) {
    %c0_i32 = arith.constant 0 : i32
    %c0_i32_0 = arith.constant 0 : i32
    %c0_i32_1 = arith.constant 0 : i32
    return %c0_i32, %c0_i32_0 : i32, i32
  }
  func.func @transform_2(%arg0: i32) -> (i32, i32) {
    %c0_i32 = arith.constant 0 : i32
    %c0_i32_0 = arith.constant 0 : i32
    return %arg0, %c0_i32 : i32, i32
  }
}

</mosaic_0001>

<bundles_post_ra>
// kernel: forward.1
= control target key start
LH: loop header
LB: loop body
LE: loop exit
PB: predicated region body
PF: predicated region fallthrough
CT: control target
= control target key end

     0   :  { %7 = vsyncpa [#allocation4], 0  ;;  %s616_s9 = smov [#allocation3]   ;;  %s701_s0 = inlined_call_operand.vmem [shape: bf16[2,8], index: 0, kind: input, shape index: {}]   ;;  %s702_s1 = inlined_call_operand.hbm [shape: bf16[408,128], index: 1, kind: input, shape index: {}]   ;;  %s703_s2 = inlined_call_operand.vmem [shape: f32[2,128], index: 2, kind: output, shape index: {}]  }
   0x1   :  { %s15_s10 = sshll.u32 %s616_s9, 4  ;;  %s592_s13 = scalar_lea.hbm %s702_s1, 3264  ;;  %s16_s10 = int_to_ptr.vmem [resolvable:$true] %s15_s10 }
   0x2   :  { %p593_p0 = scmp.ne.s32.totalorder %s702_s1, %s592_s13  ;;  %p596_p1 = scmp.lt.u32.totalorder %s592_s13, %s702_s1 }
   0x4   :  { %p598_p2 = pnand %p596_p1, %p593_p0 }
   0x6   :  { %601 = shalt.err (!%p598_p2)
}
   0x7   :  { %s602_s18 = scalar_lea.vmem %s16_s10, 3264  ;;  %p607_p4 = scmp.lt.s32.totalorder %s16_s10, %s16_s10 }
   0x8   :  { %p603_p3 = scmp.ne.s32.totalorder %s16_s10, %s602_s18  ;;  %p608_p5 = scmp.lt.s32.totalorder %s602_s18, %s602_s18 }
   0xa   :  { %p609_p6 = por %p608_p5, %p607_p4 }
   0xc   :  { %p610_p7 = pnand %p609_p6, %p603_p3 }
   0xe   :  { %613 = shalt.err (!%p610_p7)
}
   0xf   :  { %s617_s19 = smov 64   ;;  %s618_s20 = smov 4  }
  0x10   :  { %21 = dma.hbm_to_vmem [thread:$0]  %s702_s1, 3264, %s16_s10, [#allocation4], %s617_s19, %s617_s19, %s618_s20  }
  0x11   :  { %614 = dma.done.wait [#allocation4], 3264  }
  0x12   :  { %615 = vsyncadd [#allocation4], 4294964032  ;;  %v619_v0 = vmov 0.0   ;;  %vm620_vm0 = vmmov 0   ;;  %v621_v1 = vmov 0   ;;  %v40_v4 = vlaneseq  ;;  %v566_v5 = vld [vmem:[#allocation3] sm:$0xff]  }
  0x13   :  { %499 = vmatprep.subr.bf16.mxu0 %v619_v0  ;;  %515 = vmatprep.mubr.msk.bf16.mxu0 %vm620_vm0, %v619_v0  ;;  %26 = vst [vmem:[#allocation2] sm:$0xf] %v621_v1  ;;  %v622_v2 = vmov 1935823168   ;;  %v567_v6 = vld [vmem:[#allocation3 + $0x8] sm:$0xff]   ;;  %v568_v9 = vld [vmem:[#allocation3 + $0x10] sm:$0xff]  }
  0x14   :  { %519 = vmatprep.subr.bf16.mxu1 %v619_v0  ;;  %535 = vmatprep.mubr.msk.bf16.mxu1 %vm620_vm0, %v619_v0  ;;  %v38_v3 = vunpack.c.l.s4 %v622_v2  ;;  %v658_v8 = vshrl.u32 %v40_v4, 7  ;;  %v569_v11 = vld [vmem:[#allocation3 + $0x18] sm:$0xff]   ;;  %v27_v12 = vld [vmem:[%s701_s0] sm:$0x1]  ;;  %v28_v13 = vld [vmem:[%s701_s0 + $0x1] sm:$0x1] }
  0x15   :  { %500 = vmatpush3.bf16.msra.mxu0 %v566_v5  ;;  %v29_v14 = vld [vmem:[%s701_s0 + $0x2] sm:$0x1]  ;;  %v30_v15 = vld [vmem:[%s701_s0 + $0x3] sm:$0x1]  ;;  %v574_v18 = vld [vmem:[#allocation3 + $0x40] sm:$0xff]   ;;  %vm60_vm1 = vcmask 60416  }
  0x16   :  { %501 = vmatprep.subr.bf16.mxu0 %v619_v0  ;;  %v39_v7 = vunpack.c.0.s8 %v38_v3  ;;  %v35_v16 = vcombine.low %v27_v12, %v29_v14  ;;  %v36_v17 = vcombine.low %v28_v13, %v30_v15  ;;  %520 = vmatpush3.bf16.msra.mxu1 %v574_v18  ;;  %v575_v21 = vld [vmem:[#allocation3 + $0x48] sm:$0xff]   ;;  %v570_v22 = vld [vmem:[#allocation3 + $0x20] sm:$0xff]   ;;  %v576_v24 = vld [vmem:[#allocation3 + $0x50] sm:$0xff]   ;;  %v83_v43 = vsub.s32 0, %v658_v8 }
  0x17   :  { %521 = vmatprep.subr.bf16.mxu1 %v619_v0  ;;  %v571_v25 = vld [vmem:[#allocation3 + $0x28] sm:$0xff]   ;;  %v577_v27 = vld [vmem:[#allocation3 + $0x58] sm:$0xff]   ;;  %v572_v28 = vld [vmem:[#allocation3 + $0x30] sm:$0xff]   ;;  %v398_v12 = vand.u32 127, %v40_v4 }
  0x18   :  { %v42_v10 = vsub.s32 %v39_v7, %v658_v8  ;;  %v578_v29 = vld [vmem:[#allocation3 + $0x60] sm:$0xff]   ;;  %v573_v30 = vld [vmem:[#allocation3 + $0x38] sm:$0xff]   ;;  %v579_v31 = vld [vmem:[#allocation3 + $0x68] sm:$0xff]  }
  0x19   :  { %502 = vmatpush3.bf16.msra.mxu0 %v567_v6  ;;  %v580_v33 = vld [vmem:[#allocation3 + $0x70] sm:$0xff]   ;;  %v581_v34 = vld [vmem:[#allocation3 + $0x78] sm:$0xff]   ;;  %v582_v35 = vld [vmem:[#allocation3 + $0x80] sm:$0xff]   ;;  %vm399_vm2 = vcmp.ge.s32.totalorder %v398_v12, 4  ;;  %vm400_vm3 = vcmp.lt.s32.totalorder %v398_v12, 8 }
  0x1a   :  { %503 = vmatprep.subr.bf16.mxu0 %v619_v0  ;;  %v43_v19 = vrot.slane %v35_v16, %v42_v10  ;;  %v50_v20 = vrot.slane %v36_v17, %v42_v10  ;;  %522 = vmatpush3.bf16.msra.mxu1 %v575_v21  ;;  %v583_v36 = vld [vmem:[#allocation3 + $0x88] sm:$0xff]   ;;  %v584_v37 = vld [vmem:[#allocation3 + $0x90] sm:$0xff]   ;;  %v585_v38 = vld [vmem:[#allocation3 + $0x98] sm:$0xff]  }
  0x1b   :  { %523 = vmatprep.subr.bf16.mxu1 %v619_v0  ;;  %v586_v39 = vld [vmem:[#allocation3 + $0xa0] sm:$0xff]   ;;  %v587_v40 = vld [vmem:[#allocation3 + $0xa8] sm:$0xff]   ;;  %v588_v52 = vld [vmem:[#allocation3 + $0xb0] sm:$0xff]  }
  0x1c   :  { %v51_v23 = vcombine.low %v43_v19, %v50_v20  ;;  %v79_v41 = vld [vmem:[#allocation3 + $0xc0] sm:$0x1]  ;;  %v589_v53 = vld [vmem:[#allocation3 + $0xb8] sm:$0xff]   ;;  %v191_v54 = vld [vmem:[#allocation3 + $0xc4] sm:$0x1] }
  0x1d   :  { %504 = vmatpush3.bf16.msra.mxu0 %v568_v9  ;;  %v80_v42 = vunpack.c.l.bf16 %v79_v41  ;;  %v192_v55 = vunpack.c.l.bf16 %v191_v54  ;;  %v303_v1 = vld [vmem:[#allocation3 + $0xc8] sm:$0x1]  ;;  %vm401_vm4 = vmand %vm399_vm2, %vm400_vm3 }
  0x1e   :  { %505 = vmatprep.subr.bf16.mxu0 %v619_v0  ;;  %v58_v26 = vrot.slane %v51_v23, %v42_v10  ;;  %524 = vmatpush3.bf16.msra.mxu1 %v576_v24  ;;  %v304_v2 = vunpack.c.l.bf16 %v303_v1 }
  0x1f   :  { %525 = vmatprep.subr.bf16.mxu1 %v619_v0  ;;  %v84_v44 = vrot.slane %v80_v42, %v83_v43  ;;  %v196_v56 = vrot.slane %v192_v55, %v83_v43 }
  0x20   :  { %61 = vst.msk [vmem:[#allocation2] sm:$0xf] %vm60_vm1, %v58_v26  ;;  %v308_v3 = vrot.slane %v304_v2, %v83_v43 }
  0x21   :  { %506 = vmatpush3.bf16.msra.mxu0 %v569_v11 }
  0x22   :  { %507 = vmatprep.subr.bf16.mxu0 %v619_v0  ;;  %526 = vmatpush3.bf16.msra.mxu1 %v577_v27 }
  0x23   :  { %527 = vmatprep.subr.bf16.mxu1 %v619_v0 }
  0x25   :  { %508 = vmatpush3.bf16.msra.mxu0 %v570_v22 }
  0x26   :  { %509 = vmatprep.subr.bf16.mxu0 %v619_v0  ;;  %528 = vmatpush3.bf16.msra.mxu1 %v578_v29 }
  0x27   :  { %529 = vmatprep.subr.bf16.mxu1 %v619_v0  ;;  %v62_v32 = vld [vmem:[#allocation2] sm:$0xf] }
  0x29   :  { %510 = vmatpush3.bf16.msra.mxu0 %v571_v25 }
  0x2a   :  { %511 = vmatprep.subr.bf16.mxu0 %v619_v0  ;;  %530 = vmatpush3.bf16.msra.mxu1 %v579_v31 }
  0x2b   :  { %531 = vmatprep.subr.bf16.mxu1 %v619_v0 }
  0x2d   :  { %512 = vmatpush3.bf16.msra.mxu0 %v572_v28 }
  0x2e   :  { %513 = vmatprep.subr.bf16.mxu0 %v619_v0  ;;  %532 = vmatpush3.bf16.msra.mxu1 %v580_v33 }
  0x2f   :  { %533 = vmatprep.subr.bf16.mxu1 %v619_v0 }
  0x31   :  { %514 = vmatpush3.bf16.msra.mxu0 %v573_v30 }
  0x32   :  { %539 = vmatprep.subr.bf16.mxu0 %v619_v0  ;;  %534 = vmatpush3.bf16.msra.mxu1 %v581_v34 }
  0x34   :  { %516 = vmatmul.mubr.bf16.vlgmr.msra.gmra.mrb[0].mxu0 %v62_v32 }
  0x35   :  { %555 = vmatprep.mubr.msk.bf16.mxu0 %vm620_vm0, %v619_v0  ;;  %540 = vmatpush3.bf16.msra.mxu0 %v582_v35 }
  0x36   :  { %541 = vmatprep.subr.bf16.mxu0 %v619_v0 }
  0x39   :  { %542 = vmatpush3.bf16.msra.mxu0 %v583_v36 }
  0x3a   :  { %543 = vmatprep.subr.bf16.mxu0 %v619_v0 }
  0x3d   :  { %544 = vmatpush3.bf16.msra.mxu0 %v584_v37 }
  0x3e   :  { %545 = vmatprep.subr.bf16.mxu0 %v619_v0 }
  0x41   :  { %546 = vmatpush3.bf16.msra.mxu0 %v585_v38 }
  0x42   :  { %547 = vmatprep.subr.bf16.mxu0 %v619_v0 }
  0x45   :  { %548 = vmatpush3.bf16.msra.mxu0 %v586_v39 }
  0x46   :  { %549 = vmatprep.subr.bf16.mxu0 %v619_v0 }
  0x49   :  { %550 = vmatpush3.bf16.msra.mxu0 %v587_v40 }
  0x4a   :  { %551 = vmatprep.subr.bf16.mxu0 %v619_v0 }
  0x4d   :  { %552 = vmatpush3.bf16.msra.mxu0 %v588_v52 }
  0x4e   :  { %553 = vmatprep.subr.bf16.mxu0 %v619_v0 }
  0x51   :  { %554 = vmatpush3.bf16.msra.mxu0 %v589_v53 }
 0x107   :  { %v167_v45 = vpop.f32.mrb[0].mxu0 }
 0x108   :  { %v168_v46 = vadd.f32 %v167_v45, %v84_v44  ;;  %v517_v47 = vpop.f32.mrb[1].mxu0 }
 0x109   :  { %v170_v48 = vpop.f32.mrb[2].mxu0 }
 0x10a   :  { %v173_v49 = vmax.f32 %v168_v46, 0.0  ;;  %v518_v50 = vpop.f32.mrb[3].mxu0 }
 0x10c   :  { %v174_v51 = vpack.c.bf16 %v173_v49, %v173_v49 }
 0x10e   :  { %536 = vmatmul.mubr.bf16.vlgmr.msra.gmra.mrb[0].mxu1 %v174_v51 }
 0x1e1   :  { %v279_v57 = vpop.f32.mrb[0].mxu1 }
 0x1e2   :  { %v280_v58 = vadd.f32 %v279_v57, %v196_v56  ;;  %v537_v59 = vpop.f32.mrb[1].mxu1 }
 0x1e3   :  { %v282_v60 = vpop.f32.mrb[2].mxu1 }
 0x1e4   :  { %v285_v61 = vmax.f32 %v280_v58, 0.0  ;;  %v538_v62 = vpop.f32.mrb[3].mxu1 }
 0x1e6   :  { %v286_v63 = vpack.c.bf16 %v285_v61, %v285_v61 }
 0x1e8   :  { %556 = vmatmul.mubr.bf16.vlgmr.msra.gmra.mrb[4].mxu0 %v286_v63 }
 0x2bb   :  { %v391_v5 = vpop.f32.mrb[4].mxu0 }
 0x2bc   :  { %v392_v6 = vadd.f32 %v391_v5, %v308_v3  ;;  %v557_v7 = vpop.f32.mrb[5].mxu0 }
 0x2bd   :  { %v394_v0 = vpop.f32.mrb[6].mxu0 }
 0x2be   :  { %v402_v8 = vmax.f32 %v392_v6, -20.0  ;;  %v558_v9 = vpop.f32.mrb[7].mxu0 }
 0x2c0   :  { %v403_v10 = vmin.f32 %v402_v8, 2.0 }
 0x2c2   :  { %v404_v11 = vmul.f32 1.442695, %v403_v10 }
 0x2c4   :  { %590 = vpow2.f32 %v404_v11 }
 0x2ce   :  { %v591_v13 = vpop.eup %590 }
 0x2cf   :  { %v406_v14 = vsel %vm401_vm4, %v591_v13, %v392_v6 }
 0x2d0   :  { %407 = vst [vmem:[#allocation5] sm:$0xff] %v406_v14 }
 0x2d7   :  { %v425_v15 = vld [vmem:[#allocation5] sm:$0x3] }
 0x2d8   :  { %426 = vst [vmem:[%s703_s2] sm:$0x3] %v425_v15 }
 0x2d9   :  { %443 = vsyncpa [#allocation4], 1 }

</bundles_post_ra>
